<compile_context>
chip_gen: v6e
topology: v6e:2x2x1
jax: 0.10.0
libtpu: 0.0.40
codegen_flags: <defaults>
</compile_context>

<pallas_src>
import functools

import numpy as np
import jax
import jax.numpy as jnp
from jax.experimental import pallas as pl
from jax.experimental.pallas import tpu as pltpu

_LANES = 128


def _int_pow(x, n: int):
    """x ** n for a static integer n >= 1 via repeated multiplication.

    Keeps the per-element power on the 4-wide VPU slots instead of lowering
    to exp(n*log(x)) on the single EUP slot.
    """
    assert n >= 1
    acc = None
    while True:
        if n & 1:
            acc = x if acc is None else acc * x
        n >>= 1
        if n == 0:
            return acc
        x = x * x


# ---------------------------------------------------------------------------
# Pallas kernel: streamed GeM reduction over an NCHW feature map viewed as
# (N, C, S). One grid step consumes a (1, bc, bs) tile.
# ---------------------------------------------------------------------------
def _gem_kernel(x_ref, o_ref, acc_ref, *, p_int, inv_p, eps, inv_hw):
    # x_ref  : (1, bc, bs) tile of the (N, C, S) feature map, in VMEM.
    # o_ref  : (1, 1, bc) pooled output block (same block across the s axis).
    # acc_ref: (bc, 128) f32 per-lane partial sums (VMEM scratch).
    sb = pl.program_id(2)

    @pl.when(sb == 0)
    def _init():
        acc_ref[...] = jnp.zeros_like(acc_ref)

    bs = x_ref.shape[-1]
    n_full = bs // _LANES
    rem = bs - n_full * _LANES

    acc = acc_ref[...]
    for j in range(n_full):  # static, lane-tile-aligned chunks (pure VPU adds)
        xs = x_ref[0, :, j * _LANES:(j + 1) * _LANES].astype(jnp.float32)
        acc = acc + _int_pow(jnp.maximum(xs, eps), p_int)
    if rem:  # only taken when S is not a multiple of 128 (single spatial step)
        xs = x_ref[0, :, n_full * _LANES:].astype(jnp.float32)
        acc = acc.at[:, :rem].add(_int_pow(jnp.maximum(xs, eps), p_int))
    acc_ref[...] = acc

    @pl.when(sb == pl.num_programs(2) - 1)
    def _finalize():
        total = jnp.sum(acc_ref[...], axis=-1)     # one 128->1 cross-lane reduce
        mean = total * inv_hw                      # spatial mean, (bc,)
        # Fractional root only on the tiny per-channel result.
        o_ref[...] = (mean ** inv_p).astype(o_ref.dtype)[None, None, :]


# ---------------------------------------------------------------------------
# Block-size selection.
# ---------------------------------------------------------------------------
def _pick_blocks(N, C, S, itemsize, band_bytes, max_bc=512, max_chunks=32):
    # Channel block: a divisor of C that is a multiple of 8 (or C itself).
    chan_cands = [d for d in range(1, min(C, max_bc) + 1)
                  if C % d == 0 and (d % 8 == 0 or d == C)]
    if not chan_cands:
        chan_cands = [C]
    bc = chan_cands[-1]
    # Keep >= 2 parallel (batch, channel-block) units so v7x's second
    # TensorCore / megacore has work even at N == 1.
    if N * (C // bc) < 2:
        for d in reversed(chan_cands):
            if C // d >= 2:
                bc = d
                break

    # Spatial block: a multiple of 128 dividing S, sized to the band budget
    # and to a bounded static unroll count. If S is not 128-aligned, take all
    # of S in a single spatial step (rare; e.g. 7x7 maps).
    if S % _LANES == 0:
        budget = band_bytes // max(bc * itemsize, 1)
        budget = min(budget, max_chunks * _LANES)
        budget = max(_LANES, (budget // _LANES) * _LANES)
        bs = _LANES
        for cand in range(min(S, budget), _LANES - 1, -_LANES):
            if S % cand == 0:
                bs = cand
                break
    else:
        bs = S
    return bc, bs


# ---------------------------------------------------------------------------
# Wrapper.
# ---------------------------------------------------------------------------
def gem_forward(x, p=3, eps=1e-6, band_bytes=8 << 20):
    """Pallas implementation of GeMmp.forward: (N, C, H, W) -> (N, C, 1, 1)."""
    N, C, H, W = x.shape
    S = H * W
    p_int = int(p)                                # mirrors int(self.p.item())
    assert p_int >= 1
    itemsize = x.dtype.itemsize

    x3 = x.reshape(N, C, S)                       # metadata-only, no HBM traffic
    bc, bs = _pick_blocks(N, C, S, itemsize, band_bytes)
    grid = (N, C // bc, S // bs)

    kernel = functools.partial(
        _gem_kernel, p_int=p_int, inv_p=1.0 / float(p_int),
        eps=float(eps), inv_hw=1.0 / float(S))

    # Explicit VMEM budget: double-buffered input band + output + scratch.
    in_block = bc * bs * itemsize
    out_block = bc * itemsize
    scratch = bc * _LANES * 4
    vmem_limit = int(min(max(2 * in_block + 2 * out_block + scratch + (4 << 20),
                             16 << 20), 48 << 20))

    out = pl.pallas_call(
        kernel,
        out_shape=jax.ShapeDtypeStruct((N, 1, C), x.dtype),
        grid_spec=pltpu.PrefetchScalarGridSpec(
            num_scalar_prefetch=0,
            grid=grid,
            in_specs=[pl.BlockSpec((1, bc, bs), lambda n, c, s: (n, c, s))],
            out_specs=pl.BlockSpec((1, 1, bc), lambda n, c, s: (n, 0, c)),
            scratch_shapes=[pltpu.VMEM((bc, _LANES), jnp.float32)],
        ),
        compiler_params=pltpu.CompilerParams(
            dimension_semantics=("parallel", "parallel", "arbitrary"),
            vmem_limit_bytes=vmem_limit),
    )(x3)

    # PyTorch returns (N, C, 1, 1).
    return out.reshape(N, C, 1, 1)


class GeMmp:
    """JAX mirror of the PyTorch GeMmp module (forward pass only)."""

    def __init__(self, p=3, mp=1, eps=1e-6):
        self.p = jnp.ones((mp,), jnp.float32) * p
        self.mp = mp
        self.eps = eps

    def __call__(self, x):
        # mirrors int(self.p.unsqueeze(-1).unsqueeze(-1).item())
        return gem_forward(x, p=int(self.p.reshape(-1)[0]), eps=self.eps)


# ---------------------------------------------------------------------------
# Pure-JAX reference (mirrors the PyTorch forward) for correctness checks.
# ---------------------------------------------------------------------------
def gem_reference(x, p=3, eps=1e-6):
    xp = jnp.maximum(x.astype(jnp.float32), eps) ** p
    out = jnp.mean(xp, axis=(2, 3), keepdims=True) ** (1.0 / p)
    return out.astype(x.dtype)


if __name__ == "__main__":
    key = jax.random.PRNGKey(0)
    k1, k2 = jax.random.split(key)

    # Small shape consistent with the module: batch=2, channels=4, spatial=16.
    x_small = jax.random.normal(k1, (2, 4, 16, 16), jnp.float32)
    pool = GeMmp(p=3, mp=1, eps=1e-6)
    out = jax.block_until_ready(pool(x_small))
    ref = gem_reference(x_small, p=3, eps=1e-6)
    assert out.shape == (2, 4, 1, 1)
    np.testing.assert_allclose(np.asarray(out), np.asarray(ref),
                               rtol=2e-5, atol=2e-5)

    # Second shape: exercises channel blocking (parallel C axis at N=1) and
    # the multi-chunk per-lane accumulation path.
    x_big = jax.random.normal(k2, (1, 256, 16, 16), jnp.float32)
    out2 = jax.block_until_ready(gem_forward(x_big, p=3, eps=1e-6))
    ref2 = gem_reference(x_big, p=3, eps=1e-6)
    np.testing.assert_allclose(np.asarray(out2), np.asarray(ref2),
                               rtol=2e-5, atol=2e-5)

    print("KERNEL_OK")
</pallas_src>

<mosaic_0001>
module attributes {stable_mosaic.version = 11 : i64} {
  func.func @_gem_kernel(%arg0: i32, %arg1: i32, %arg2: i32, %arg3: memref<1x4x256xf32, #tpu.memory_space<vmem>>, %arg4: memref<1x1x4xf32, #tpu.memory_space<vmem>>, %arg5: memref<4x128xf32, #tpu.memory_space<vmem>>) attributes {dimension_semantics = [#tpu.dimension_semantics<parallel>, #tpu.dimension_semantics<parallel>, #tpu.dimension_semantics<arbitrary>], iteration_bounds = array<i64: 2, 1, 1>, scalar_prefetch = 0 : i64, scratch_operands = 1 : i64, tpu.core_type = #tpu.core_type<tc>, window_params = [{transform_indices = @transform_0, window_bounds = array<i64: 1, 4, 256>}, {transform_indices = @transform_1, window_bounds = array<i64: 1, 1, 4>}]} {
    %c0_i32 = arith.constant 0 : i32
    %0 = arith.cmpi eq, %arg2, %c0_i32 : i32
    %1 = arith.extui %0 : i1 to i32
    %c0_i32_0 = arith.constant 0 : i32
    %2 = arith.cmpi ne, %1, %c0_i32_0 : i32
    scf.if %2 {
      %cst_12 = arith.constant 0.000000e+00 : f32
      %22 = vector.broadcast %cst_12 : f32 to vector<4x128xf32>
      %c0_13 = arith.constant 0 : index
      %c0_14 = arith.constant 0 : index
      %23 = vector.load %arg5[%c0_13, %c0_14] : memref<4x128xf32, #tpu.memory_space<vmem>>, vector<4x128xf32>
      tpu.vector_store %arg5[%c0_13, %c0_14], %22 {strides = array<i32>} : memref<4x128xf32, #tpu.memory_space<vmem>>, vector<4x128xf32>,
    } else {
    }
    %c0 = arith.constant 0 : index
    %c0_1 = arith.constant 0 : index
    %3 = vector.load %arg5[%c0, %c0_1] : memref<4x128xf32, #tpu.memory_space<vmem>>, vector<4x128xf32>
    %c0_2 = arith.constant 0 : index
    %c0_3 = arith.constant 0 : index
    %c0_4 = arith.constant 0 : index
    %4 = vector.load %arg3[%c0_2, %c0_3, %c0_4] : memref<1x4x256xf32, #tpu.memory_space<vmem>>, vector<1x4x128xf32>
    %5 = vector.shape_cast %4 : vector<1x4x128xf32> to vector<4x128xf32>
    %cst = arith.constant 9.99999997E-7 : f32
    %6 = vector.broadcast %cst : f32 to vector<4x128xf32>
    %7 = arith.maximumf %5, %6 : vector<4x128xf32>
    %8 = arith.mulf %7, %7 : vector<4x128xf32>
    %9 = arith.mulf %7, %8 : vector<4x128xf32>
    %10 = arith.addf %3, %9 : vector<4x128xf32>
    %c0_5 = arith.constant 0 : index
    %c0_6 = arith.constant 0 : index
    %c128 = arith.constant 128 : index
    %11 = vector.load %arg3[%c0_5, %c0_6, %c128] : memref<1x4x256xf32, #tpu.memory_space<vmem>>, vector<1x4x128xf32>
    %12 = vector.shape_cast %11 : vector<1x4x128xf32> to vector<4x128xf32>
    %cst_7 = arith.constant 9.99999997E-7 : f32
    %13 = vector.broadcast %cst_7 : f32 to vector<4x128xf32>
    %14 = arith.maximumf %12, %13 : vector<4x128xf32>
    %15 = arith.mulf %14, %14 : vector<4x128xf32>
    %16 = arith.mulf %14, %15 : vector<4x128xf32>
    %17 = arith.addf %10, %16 : vector<4x128xf32>
    %c0_8 = arith.constant 0 : index
    %c0_9 = arith.constant 0 : index
    %18 = vector.load %arg5[%c0_8, %c0_9] : memref<4x128xf32, #tpu.memory_space<vmem>>, vector<4x128xf32>
    tpu.vector_store %arg5[%c0_8, %c0_9], %17 {strides = array<i32>} : memref<4x128xf32, #tpu.memory_space<vmem>>, vector<4x128xf32>,
    %c0_i32_10 = arith.constant 0 : i32
    %19 = arith.cmpi eq, %arg2, %c0_i32_10 : i32
    %20 = arith.extui %19 : i1 to i32
    %c0_i32_11 = arith.constant 0 : i32
    %21 = arith.cmpi ne, %20, %c0_i32_11 : i32
    scf.if %21 {
      %c0_12 = arith.constant 0 : index
      %c0_13 = arith.constant 0 : index
      %22 = vector.load %arg5[%c0_12, %c0_13] : memref<4x128xf32, #tpu.memory_space<vmem>>, vector<4x128xf32>
      %cst_14 = arith.constant dense<0.000000e+00> : vector<4xf32>
      %23 = vector.multi_reduction <add>, %22, %cst_14 [1] : vector<4x128xf32> to vector<4xf32>
      %cst_15 = arith.constant 3.906250e-03 : f32
      %24 = vector.broadcast %cst_15 : f32 to vector<4xf32>
      %25 = arith.mulf %23, %24 : vector<4xf32>
      %cst_16 = arith.constant 0.333333343 : f32
      %26 = vector.broadcast %cst_16 : f32 to vector<4xf32>
      %27 = math.powf %25, %26 : vector<4xf32>
      %28 = vector.shape_cast %27 : vector<4xf32> to vector<1x1x4xf32>
      %c0_17 = arith.constant 0 : index
      %c0_18 = arith.constant 0 : index
      %c0_19 = arith.constant 0 : index
      %29 = vector.load %arg4[%c0_17, %c0_18, %c0_19] : memref<1x1x4xf32, #tpu.memory_space<vmem>>, vector<1x1x4xf32>
      tpu.vector_store %arg4[%c0_17, %c0_18, %c0_19], %28 {strides = array<i32>} : memref<1x1x4xf32, #tpu.memory_space<vmem>>, vector<1x1x4xf32>,
    } else {
    }
    return
  }
  func.func @transform_0(%arg0: i32, %arg1: i32, %arg2: i32) -> (i32, i32, i32) {
    %c0_i32 = arith.constant 0 : i32
    return %arg0, %arg1, %arg2 : i32, i32, i32
  }
  func.func @transform_1(%arg0: i32, %arg1: i32, %arg2: i32) -> (i32, i32, i32) {
    %c0_i32 = arith.constant 0 : i32
    %c0_i32_0 = arith.constant 0 : i32
    return %arg0, %c0_i32, %arg1 : i32, i32, i32
  }
}

</mosaic_0001>

<bundles_post_ra>
// kernel: tpu_custom_call.1
= control target key start
LH: loop header
LB: loop body
LE: loop exit
PB: predicated region body
PF: predicated region fallthrough
CT: control target
= control target key end

     0   :  { %6 = vsyncpa [#allocation4], 0  ;;  %s652_s0 = inlined_call_operand.hbm [shape: f32[2,4,256], index: 0, kind: input, shape index: {}]   ;;  %s653_s1 = inlined_call_operand.hbm [shape: f32[2,1,4], index: 1, kind: output, shape index: {}]  }
   0x1   :  { %8 = vsyncpa [#allocation4 + $0x1], 0 }
   0x2   :  { %9 = vsyncpa [#allocation5], 0 }
   0x3   :  { %11 = vsyncpa [#allocation5 + $0x1], 0  ;;  %s517_s6 = smov 0   ;;  %s519_s7 = smov 0  }
   0x4   :  { %s521_s8 = smov 0   ;;  %s523_s9 = smov 0  }
   0x5   :  { %s525_s10 = smov 0   ;;  %s527_s11 = smov 0  }
   0x6 LB: > { %s296_s12 = sadd.s32 4294967295, %s502_s11   ;;  %s297_s13 = sadd.s32 4294967294, %s502_s11   ;;  %s502_s11 = sphi %s527_s11, %s17_s11   ;;  %s498_s10 = sphi %s525_s10, %s665_s10   ;;  %s494_s9 = sphi %s523_s9, %s664_s9   ;;  %s490_s8 = sphi %s521_s8, %s663_s8   ;;  %s486_s7 = sphi %s519_s7, %s662_s7   ;;  %s482_s6 = sphi %s517_s6, %s661_s6  }
   0x7   : > { %s36_s14 = sadd.s32 1, %s498_s10  ;;  %s47_s15 = sadd.s32 1, %s490_s8 }
   0x8   : > { %p38_p0 = scmp.ge.s32.totalorder %s36_s14, 2  ;;  %p54_p1 = scmp.ne.s32.totalorder %s490_s8, %s486_s7 }
   0x9   : > { %p55_p2 = scmp.eq.s32.totalorder %s502_s11, 0  ;;  %p60_p3 = scmp.ne.s32.totalorder %s486_s7, %s482_s6 }
   0xa   : > { %s667_s14 = smov (%p38_p0, %s36_s14), 0  ;;  %p61_p5 = scmp.eq.s32.totalorder %s296_s12, 0 }
   0xb   : > { %p558_p4 = por %p55_p2, %p54_p1  ;;  %s40_s17 = ssub.s32 %s498_s10, %s667_s14 }
   0xc   : > { %p86_p6 = scmp.eq.s32.totalorder %s296_s12, 1  ;;  %p45_p7 = scmp.eq.s32.totalorder %s40_s17, 0 }
   0xd   : > { %p564_p8 = por %p61_p5, %p60_p3  ;;  %p92_p10 = scmp.eq.s32.totalorder %s297_s13, 1 }
   0xe   : > { %p568_p9 = por %p86_p6, %p54_p1  ;;  %p339_p13 = scmp.lt.s32.totalorder %s502_s11, 2 }
   0xf   : > { %s573_s20 = scalar_select %p45_p7, %s490_s8, %s47_s15  }
  0x10   : > { %p575_p11 = por %p92_p10, %p60_p3  ;;  %s112_s22 = sand.u32 1, %s490_s8  }
  0x11   : > { %s300_s23 = sshll.u32 %s112_s22, 3  ;;  %s308_s24 = sshll.u32 %s498_s10, 7 }
  0x12   : > { %s657_s21 = scalar_select %p575_p11, 1, 0 }
  0x13   : > { %s126_s27 = scalar_lea.hbm %s652_s0, %s308_s24  ;;  %s116_s28 = scalar_lea.vmem [#allocation3], %s300_s23 }
  0x14   : > { %s128_s29 = sshll.u32 %s116_s28, 4  ;;  %p588_p0 = pnand %p339_p13, %p558_p4  ;;  %s129_s29 = int_to_ptr.vmem [resolvable:$true] %s128_s29 }
  0x15   : > { %p303_p1 = scmp.ge.s32.totalorder %s502_s11, 1  ;;  %p133_p2 = scmp.lt.s32.totalorder %s502_s11, 3 }
  0x16   : > { %s113_s2 = scalar_lea.sflag [#allocation4], %s112_s22  ;;  %p396_p3 = pneg %p588_p0 }
  0x17   : > { %s407_s3 = scalar_lea.vmem %s129_s29, 128  ;;  %s504_s4 = smov [#allocation3]  }
  0x18   : > { %p408_p5 = scmp.ne.s32.totalorder %s129_s29, %s407_s3  ;;  %s412_s5 = sshll.u32 %s504_s4, 4  ;;  %s413_s5 = int_to_ptr.vmem [resolvable:$false] %s412_s5 }
  0x19   : > { %s414_s12 = scalar_lea.vmem %s413_s5, 256  ;;  %p415_p10 = scmp.lt.s32.totalorder %s129_s29, %s413_s5 }
  0x1a   : > { %p410_p6 = pnand %p408_p5, %p396_p3  ;;  %p416_p12 = scmp.lt.s32.totalorder %s414_s12, %s407_s3 }
  0x1c   : > { %p411_p7 = pneg %p410_p6  ;;  %p417_p4 = por %p416_p12, %p415_p10 }
  0x1e   : > { %p418_p13 = pnand %p417_p4, %p411_p7 }
  0x20   : > { %421 = shalt.err (!%p418_p13)
}
  0x21   : > { %334 = dma.hbm_to_vmem [thread:$0]  (!%p588_p0), %s126_s27, 128, %s129_s29, %s113_s2  }
  0x22   : > { %p134_p11 = pnand %p303_p1, %p133_p2 }
  0x23   : > { %s603_s13 = sand.u32 (!%p134_p11), 1, %s486_s7  }
  0x24   : > { %137 = sbr.rel (%p134_p11) target bundleno = 258 (0x102), region = 24  ;;  %s304_s15 = sshll.u32 (!%p134_p11), %s603_s13, 3 }
  0x25   : > { %s140_s16 = scalar_lea.sflag (!%p134_p11), [#allocation4], %s603_s13  ;;  %s143_s17 = scalar_lea.vmem (!%p134_p11), [#allocation3], %s304_s15 }
  0x29   : > { %473 = dma.done.wait (%p564_p8), %s140_s16, 128  }
  0x2a   : > { %475 = vsyncadd (%p564_p8), %s140_s16, 4294967168  ;;  %v505_v0 = vmov 0.0   ;;  %v168_v1 = vld [vmem:[%s143_s17] sm:$0xf]  ;;  %v173_v2 = vld [vmem:[%s143_s17 + $0x4] sm:$0xf]  ;;  %v190_v19 = vlaneseq }
  0x2b   : > { %166 = vst [vmem:[#allocation2] sm:$0xf] %v505_v0  ;;  %v169_v3 = vmax.f32 %v168_v1, 1e-06  ;;  %v174_v4 = vmax.f32 %v173_v2, 1e-06 }
  0x2c   : > { %vm183_vm0 = vcmask 1043456   ;;  %v191_v22 = vand.u32 127, %v190_v19  ;;  %v193_v23 = vshrl.u32 %v190_v19, 7  ;;  %s305_s18 = sshll.u32 %s494_s9, 4  ;;  %s160_s22 = scalar_lea.vmem [#allocation6], %s603_s13  ;;  %vm197_vm6 = vcmask 24576  }
  0x2d   : > { %v170_v5 = vmul.f32 %v169_v3, %v169_v3  ;;  %v175_v6 = vmul.f32 %v174_v4, %v174_v4  ;;  %s213_s23 = sshll.u32 %s160_s22, 4  ;;  %s211_s26 = scalar_lea.hbm %s653_s1, %s305_s18  ;;  %s214_s23 = int_to_ptr.vmem [resolvable:$true] %s213_s23 }
  0x2e   : > { %v194_v27 = vsub.s32 %v191_v22, %v193_v23  ;;  %s200_s27 = scalar_lea.sflag [#allocation5], %s603_s13  ;;  %s422_s28 = scalar_lea.vmem %s214_s23, 16 }
  0x2f   : > { %v171_v8 = vmul.f32 %v170_v5, %v169_v3  ;;  %v176_v9 = vmul.f32 %v175_v6, %v174_v4  ;;  %p423_p8 = scmp.ne.s32.totalorder %s214_s23, %s422_s28  ;;  %s506_s9 = smov [#allocation6]  }
  0x30   : > { %s426_s29 = sshll.u32 %s506_s9, 4  ;;  %s427_s29 = int_to_ptr.vmem [resolvable:$false] %s426_s29 }
  0x31   : > { %p424_p11 = pnand %p423_p8, %p568_p9  ;;  %s428_s30 = scalar_lea.vmem %s427_s29, 32 }
  0x32   : > { %v167_v7 = vld [vmem:[#allocation2] sm:$0xf]  ;;  %p429_p0 = scmp.lt.s32.totalorder %s214_s23, %s427_s29  ;;  %p430_p1 = scmp.lt.s32.totalorder %s428_s30, %s422_s28 }
  0x33   : > { %v172_v10 = vadd.f32 %v171_v8, %v167_v7  ;;  %p425_p12 = pneg %p424_p11 }
  0x34   : > { %p431_p2 = por %p430_p1, %p429_p0 }
  0x35   : > { %v177_v11 = vadd.f32 %v176_v9, %v172_v10 }
  0x36   : > { %p432_p3 = pnand %p431_p2, %p425_p12 }
  0x37   : > { %178 = vst [vmem:[#allocation2] sm:$0xf] %v177_v11 }
  0x3e   : > { %v182_v12 = vld [vmem:[#allocation2] sm:$0xf] }
  0x3f   : > { %v184_v13 = vsel %vm183_vm0, %v182_v12, 0.0 }
  0x40   : > { %185 = vadd.xlane.f32.xlu0 %v184_v13 }
  0xc9   : > { %v186_v14 = vpop.xlane.xlu0 %185 }
  0xca   : > { %v187_v15 = vmul.f32 0.00390625, %v186_v14 }
  0xcc   : > { %v311_v16 = vand.u32 2147483647, %v187_v15  ;;  %v315_v20 = vand.u32 2147483648, %v187_v15  ;;  %vm310_vm3 = vcmp.lt.f32.partialorder %v187_v15, 0.0  ;;  %vm309_vm4 = vcmp.eq.f32.partialorder %v187_v15, 0.0 }
  0xce   : > { %390 = vlog2.f32 %v311_v16  ;;  %vm319_vm1 = vweird.f32 %v311_v16  ;;  %vm321_vm2 = vcmp.eq.f32.partialorder %v311_v16, 0.0  ;;  %vm312_vm5 = vcmp.eq.f32.partialorder %v311_v16, inf }
  0xdb   : > { %v391_v17 = vpop.eup %390 }
  0xdc   : > { %v316_v18 = vmul.f32 0.33333334, %v391_v17 }
  0xde   : > { %392 = vpow2.f32 %v316_v18 }
  0xeb   : > { %v393_v21 = vpop.eup %392 }
  0xec   : > { %v318_v24 = vor.u32 %v393_v21, %v315_v20 }
  0xee   : > { %v320_v25 = vsel %vm319_vm1, %v187_v15, %v318_v24 }
  0xef   : > { %v323_v26 = vsel %vm321_vm2, %v315_v20, %v320_v25 }
  0xf0   : > { %v324_v28 = vsel %vm310_vm3, nan, %v323_v26 }
  0xf1   : > { %v325_v29 = vsel %vm309_vm4, 0.0, %v324_v28 }
  0xf2   : > { %v326_v30 = vsel %vm312_vm5, inf, %v325_v29 }
  0xf3   : > { %v195_v31 = vrot.slane %v326_v30, %v194_v27 }
  0xf5   : > { %198 = vst.msk [vmem:[%s160_s22] sm:$0x1] %vm197_vm6, %v195_v31 }
  0xf6   : > { %435 = shalt.err (!%p432_p3)
}
  0xf7   : > { %s436_s2 = scalar_lea.hbm %s211_s26, 16  ;;  %s440_s5 = scalar_lea.hbm %s653_s1, 32 }
  0xf8   : > { %p437_p5 = scmp.ne.s32.totalorder %s211_s26, %s436_s2  ;;  %p441_p10 = scmp.lt.s32.totalorder %s211_s26, %s653_s1 }
  0xf9   : > { %p442_p4 = scmp.lt.s32.totalorder %s440_s5, %s436_s2 }
  0xfa   : > { %p438_p6 = pnand %p437_p5, %p568_p9 }
  0xfb   : > { %p443_p13 = por %p442_p4, %p441_p10 }
  0xfc   : > { %p439_p7 = pneg %p438_p6 }
  0xfe   : > { %p444_p8 = pnand %p443_p13, %p439_p7 }
 0x100   : > { %447 = shalt.err (!%p444_p8)
}
 0x101   : > { %329 = dma.vmem_to_hbm [thread:$0]  (%p568_p9), %s214_s23, 16, %s211_s26, %s200_s27  }
 0x102 PF: > { %s225_s15 = sand.u32 1, %s482_s6   ;;  %p659_p11 = scmp.ne.s32.totalorder %s657_s21, 0 }
 0x103   : > { %p660_p12 = scmp.ge.s32.totalorder %s502_s11, 2  ;;  %s226_s16 = scalar_lea.sflag [#allocation5], %s225_s15 }
 0x105   : > { %p336_p0 = pnand %p660_p12, %p659_p11 }
 0x107   : > { %p337_p1 = pneg %p336_p0 }
 0x109   : > { %477 = dma.done.wait (%p337_p1), %s226_s16, 16  }
 0x10a   : > { %479 = vsyncadd (%p337_p1), %s226_s16, 4294967280  ;;  %s17_s11 = sadd.s32 1, %s502_s11   ;;  %s661_s6 = smov %s486_s7 }
 0x10b   : > { %p14_p2 = scmp.ge.s32.totalorder %s17_s11, 4   ;;  %s662_s7 = smov %s490_s8 }
 0x10c   : > { %s663_s8 = smov %s573_s20  ;;  %s664_s9 = smov %s498_s10 }
 0x10d   : > { %s665_s10 = smov %s667_s14  ;;  %16 = sbr.rel (!%p14_p2) target bundleno = 6 (0x6), region = 77 }
 0x112   :  { %230 = vsyncpa [#allocation4], 1 }
 0x113   :  { %232 = vsyncpa [#allocation4 + $0x1], 1 }
 0x114   :  { %233 = vsyncpa [#allocation5], 1 }
 0x115   :  { %235 = vsyncpa [#allocation5 + $0x1], 1 }

</bundles_post_ra>
